<compile_context>
chip_gen: v5e
topology: v5e:2x2
jax: 0.10.0
libtpu: 0.0.40
codegen_flags: <defaults>
</compile_context>

<pallas_src>
import jax
import jax.numpy as jnp
from jax.experimental import pallas as pl
from jax.experimental.pallas import tpu as pltpu

EPS = 1e-5
_TILE_VMEM_BUDGET = 16 << 20   # live (double-buffered) tile footprint budget per pass


def _round_up(a, b):
    return (a + b - 1) // b * b


def _cdiv(a, b):
    return (a + b - 1) // b


# ---------------------------------------------------------------------------
# Pass 1: per-(batch, outer-slice) channel sum and sum-of-squares of
#         h = W_blk @ relu(x_cat), accumulated over the inner spatial tiles.
# ---------------------------------------------------------------------------
def _stats_kernel(xcat_ref, w_ref, sum_ref, sq_ref):
    @pl.when(pl.program_id(2) == 0)
    def _():
        sum_ref[...] = jnp.zeros_like(sum_ref)
        sq_ref[...] = jnp.zeros_like(sq_ref)

    x = jnp.maximum(xcat_ref[0], 0.0)                                 # [K, TM]
    h = jnp.dot(w_ref[...], x, preferred_element_type=jnp.float32)   # [C_out, TM]
    # Two plain column accumulators (VMEM-resident output blocks; no concat).
    sum_ref[0, 0] += jnp.sum(h, axis=-1, keepdims=True)              # [C_out, 1]
    sq_ref[0, 0] += jnp.sum(h * h, axis=-1, keepdims=True)           # [C_out, 1]
    # TODO(synk): for very large N*H*W, accumulate (h - c)^2 around a per-channel shift c
    # (e.g. from the first tile) to avoid E[h^2] - mean^2 cancellation in f32.


# ---------------------------------------------------------------------------
# Pass 2: recompute h and normalize with BN folded into the operands:
#         o = (inv_std * W_blk) @ relu(x_cat) + (-mean * inv_std)
# ---------------------------------------------------------------------------
def _norm_kernel(xcat_ref, wn_ref, shift_ref, o_ref):
    x = jnp.maximum(xcat_ref[0], 0.0)                                 # [K, TM]
    h = jnp.dot(wn_ref[...], x, preferred_element_type=jnp.float32)  # [C_out, TM]
    o_ref[0] = (h + shift_ref[...]).astype(o_ref.dtype)


def factorized_reduce(x_nchw, w0, b0, w1, b1):
    """stride=2 FactorizedReduce forward. x_nchw: [N, C_in, H, W] float32."""
    N, C_in, H, W = x_nchw.shape
    assert H % 2 == 0 and W % 2 == 0, "even spatial dims assumed (pad branch is a no-op)"
    Ho, Wo = H // 2, W // 2
    HoWo = Ho * Wo
    C0, C1 = w0.shape[0], w1.shape[0]
    C_out = C0 + C1
    K = 2 * C_in

    # --------------------------- tile / grid sizing ---------------------------
    M128 = _round_up(HoWo, 128)                       # lane-dense spatial extent
    per_col_bytes = 8 * (K + C_out)                   # 2x dbl-buffered f32 tiles per lane col
    tm_cap = max(128, min(M128, (_TILE_VMEM_BUDGET // per_col_bytes) // 128 * 128))
    n_mt = _cdiv(M128, tm_cap)
    TM = _round_up(_cdiv(M128, n_mt), 128)            # rebalance so tiles nearly divide M128
    m_outer = 1
    if n_mt >= 2:
        if n_mt % 2 == 0:
            m_outer = 2                                # extra parallel slices for v7x 2-TC
        elif N == 1:
            n_mt += 1                                  # one all-zero tile; harmless for stats
            m_outer = 2
    m_inner = n_mt // m_outer
    M_pad = n_mt * TM

    tile_bytes = 8 * TM * (K + C_out)
    resident_bytes = 4 * (C_out * K + 8 * C_out)
    vmem_limit = int(min(40 << 20, max(tile_bytes + resident_bytes + (4 << 20), 16 << 20)))

    # --------------------------- operand preparation ---------------------------
    # Even/odd strided sampling in per-batch channel-major layout; one fused XLA gather
    # (read x once, write compact x_cat once), zero-padded to a lane-dense spatial extent.
    x0 = x_nchw[:, :, 0::2, 0::2].reshape(N, C_in, HoWo)
    x1 = x_nchw[:, :, 1::2, 1::2].reshape(N, C_in, HoWo)
    x_cat = jnp.concatenate([x0, x1], axis=1).astype(jnp.float32)     # [N, K, HoWo]
    if M_pad != HoWo:
        x_cat = jnp.pad(x_cat, ((0, 0), (0, 0), (0, M_pad - HoWo)))   # [N, K, M_pad]

    # Fused block-diagonal weight: rows 0:C0 consume even-grid channels, rows C0: odd-grid.
    w_blk = jnp.zeros((C_out, K), jnp.float32)
    w_blk = w_blk.at[:C0, :C_in].set(w0.reshape(C0, C_in).astype(jnp.float32))
    w_blk = w_blk.at[C0:, C_in:].set(w1.reshape(C1, C_in).astype(jnp.float32))
    # b0/b1 intentionally unused: a per-channel constant bias is exactly removed by
    # training-mode, affine=False BatchNorm (mean subtraction; variance unchanged).

    # ------------------ pass 1: per-channel sum / sum-of-squares ------------------
    sum_out, sq_out = pl.pallas_call(
        _stats_kernel,
        out_shape=(jax.ShapeDtypeStruct((N, m_outer, C_out, 1), jnp.float32),
                   jax.ShapeDtypeStruct((N, m_outer, C_out, 1), jnp.float32)),
        grid=(N, m_outer, m_inner),
        in_specs=[
            pl.BlockSpec((1, K, TM), lambda n, o, m: (n, 0, o * m_inner + m)),
            pl.BlockSpec((C_out, K), lambda n, o, m: (0, 0)),
        ],
        out_specs=[
            pl.BlockSpec((1, 1, C_out, 1), lambda n, o, m: (n, o, 0, 0)),
            pl.BlockSpec((1, 1, C_out, 1), lambda n, o, m: (n, o, 0, 0)),
        ],
        compiler_params=pltpu.CompilerParams(
            dimension_semantics=("parallel", "parallel", "arbitrary"),
            vmem_limit_bytes=vmem_limit),
        cost_estimate=pl.CostEstimate(
            flops=2 * N * M_pad * K * C_out + 3 * N * M_pad * C_out,
            transcendentals=0,
            bytes_accessed=4 * (N * K * M_pad + C_out * K + 2 * N * m_outer * C_out)),
    )(x_cat, w_blk)

    # Tiny host-graph step: combine partial moments (training-mode BN, biased variance)
    # and fold BN into the pass-2 operands.
    count = float(N * HoWo)                              # true count; zero pads contribute 0
    mean = jnp.sum(sum_out, axis=(0, 1)) / count         # [C_out, 1]
    var = jnp.maximum(jnp.sum(sq_out, axis=(0, 1)) / count - mean * mean, 0.0)
    inv = jax.lax.rsqrt(var + EPS)                       # [C_out, 1]
    w_norm = w_blk * inv                                 # BN scale folded into the conv weight
    shift = -mean * inv                                  # [C_out, 1]

    # ---------------------- pass 2: recompute + normalize ----------------------
    out = pl.pallas_call(
        _norm_kernel,
        out_shape=jax.ShapeDtypeStruct((N, C_out, M_pad), jnp.float32),
        grid=(N, n_mt),
        in_specs=[
            pl.BlockSpec((1, K, TM), lambda n, m: (n, 0, m)),
            pl.BlockSpec((C_out, K), lambda n, m: (0, 0)),
            pl.BlockSpec((C_out, 1), lambda n, m: (0, 0)),
        ],
        out_specs=pl.BlockSpec((1, C_out, TM), lambda n, m: (n, 0, m)),
        compiler_params=pltpu.CompilerParams(
            dimension_semantics=("parallel", "parallel"),
            vmem_limit_bytes=vmem_limit),
        cost_estimate=pl.CostEstimate(
            flops=2 * N * M_pad * K * C_out + N * M_pad * C_out,
            transcendentals=0,
            bytes_accessed=4 * (N * K * M_pad + N * C_out * M_pad + C_out * (K + 1))),
    )(x_cat, w_norm, shift)

    # Drop the lane padding and reshape straight back to NCHW.
    return out[:, :, :HoWo].reshape(N, C_out, Ho, Wo)


def _reference(x_nchw, w0, b0, w1, b1):
    """Pure-JAX reference of the full PyTorch forward (conv biases included)."""
    C_in = x_nchw.shape[1]
    xr = jnp.maximum(x_nchw, 0.0)
    x0 = xr[:, :, 0::2, 0::2]
    x1 = xr[:, :, 1::2, 1::2]
    c0 = jnp.einsum("nchw,oc->nohw", x0, w0.reshape(w0.shape[0], C_in)) + b0[None, :, None, None]
    c1 = jnp.einsum("nchw,oc->nohw", x1, w1.reshape(w1.shape[0], C_in)) + b1[None, :, None, None]
    out = jnp.concatenate([c0, c1], axis=1)
    mean = jnp.mean(out, axis=(0, 2, 3), keepdims=True)
    var = jnp.mean((out - mean) ** 2, axis=(0, 2, 3), keepdims=True)
    return (out - mean) * jax.lax.rsqrt(var + EPS)


if __name__ == "__main__":
    # Module config: C_in=4, C_out=8, stride=2, affine=False (=> convs have bias,
    # BN has no gamma/beta), training-mode forward uses batch statistics.
    N, C_in, H, W = 2, 4, 16, 16
    C_out = 8
    C0, C1 = C_out // 2, C_out - C_out // 2

    key = jax.random.PRNGKey(0)
    kx, kw0, kb0, kw1, kb1 = jax.random.split(key, 5)
    x = jax.random.normal(kx, (N, C_in, H, W), dtype=jnp.float32)
    w0 = jax.random.normal(kw0, (C0, C_in, 1, 1), dtype=jnp.float32) * 0.1
    b0 = jax.random.normal(kb0, (C0,), dtype=jnp.float32) * 0.1
    w1 = jax.random.normal(kw1, (C1, C_in, 1, 1), dtype=jnp.float32) * 0.1
    b1 = jax.random.normal(kb1, (C1,), dtype=jnp.float32) * 0.1

    fwd = jax.jit(factorized_reduce)
    out = jax.block_until_ready(fwd(x, w0, b0, w1, b1))

    ref = jax.block_until_ready(_reference(x, w0, b0, w1, b1))
    assert out.shape == (N, C_out, H // 2, W // 2), out.shape
    assert jnp.allclose(out, ref, atol=1e-4, rtol=1e-4), float(jnp.max(jnp.abs(out - ref)))

    print("KERNEL_OK")
</pallas_src>

<mosaic_0001>
module attributes {stable_mosaic.version = 11 : i64} {
  func.func @_stats_kernel(%arg0: i32, %arg1: i32, %arg2: i32, %arg3: memref<1x8x128xf32, #tpu.memory_space<vmem>>, %arg4: memref<8x8xf32, #tpu.memory_space<vmem>>, %arg5: memref<1x1x8x1xf32, #tpu.memory_space<vmem>>, %arg6: memref<1x1x8x1xf32, #tpu.memory_space<vmem>>) attributes {dimension_semantics = [#tpu.dimension_semantics<parallel>, #tpu.dimension_semantics<parallel>, #tpu.dimension_semantics<arbitrary>], iteration_bounds = array<i64: 2, 1, 1>, scalar_prefetch = 0 : i64, scratch_operands = 0 : i64, tpu.core_type = #tpu.core_type<tc>, window_params = [{transform_indices = @transform_0, window_bounds = array<i64: 1, 8, 128>}, {pipeline_mode = #tpu.pipeline_mode<synchronous>, transform_indices = @transform_1, window_bounds = array<i64: 8, 8>}, {transform_indices = @transform_2, window_bounds = array<i64: 1, 1, 8, 1>}, {transform_indices = @transform_3, window_bounds = array<i64: 1, 1, 8, 1>}]} {
    %c0_i32 = arith.constant 0 : i32
    %0 = arith.cmpi eq, %arg2, %c0_i32 : i32
    %1 = arith.extui %0 : i1 to i32
    %c0_i32_0 = arith.constant 0 : i32
    %2 = arith.cmpi ne, %1, %c0_i32_0 : i32
    scf.if %2 {
      %cst_24 = arith.constant 0.000000e+00 : f32
      %26 = vector.broadcast %cst_24 : f32 to vector<1x1x8x1xf32>
      %c0_25 = arith.constant 0 : index
      %c0_26 = arith.constant 0 : index
      %c0_27 = arith.constant 0 : index
      %c0_28 = arith.constant 0 : index
      %27 = vector.load %arg5[%c0_25, %c0_26, %c0_27, %c0_28] : memref<1x1x8x1xf32, #tpu.memory_space<vmem>>, vector<1x1x8x1xf32>
      tpu.vector_store %arg5[%c0_25, %c0_26, %c0_27, %c0_28], %26 {strides = array<i32>} : memref<1x1x8x1xf32, #tpu.memory_space<vmem>>, vector<1x1x8x1xf32>,
      %cst_29 = arith.constant 0.000000e+00 : f32
      %28 = vector.broadcast %cst_29 : f32 to vector<1x1x8x1xf32>
      %c0_30 = arith.constant 0 : index
      %c0_31 = arith.constant 0 : index
      %c0_32 = arith.constant 0 : index
      %c0_33 = arith.constant 0 : index
      %29 = vector.load %arg6[%c0_30, %c0_31, %c0_32, %c0_33] : memref<1x1x8x1xf32, #tpu.memory_space<vmem>>, vector<1x1x8x1xf32>
      tpu.vector_store %arg6[%c0_30, %c0_31, %c0_32, %c0_33], %28 {strides = array<i32>} : memref<1x1x8x1xf32, #tpu.memory_space<vmem>>, vector<1x1x8x1xf32>,
    } else {
    }
    %c0 = arith.constant 0 : index
    %c0_1 = arith.constant 0 : index
    %c0_2 = arith.constant 0 : index
    %3 = vector.load %arg3[%c0, %c0_1, %c0_2] : memref<1x8x128xf32, #tpu.memory_space<vmem>>, vector<1x8x128xf32>
    %4 = vector.shape_cast %3 : vector<1x8x128xf32> to vector<8x128xf32>
    %cst = arith.constant 0.000000e+00 : f32
    %5 = vector.broadcast %cst : f32 to vector<8x128xf32>
    %6 = arith.maximumf %4, %5 : vector<8x128xf32>
    %c0_3 = arith.constant 0 : index
    %c0_4 = arith.constant 0 : index
    %7 = vector.load %arg4[%c0_3, %c0_4] : memref<8x8xf32, #tpu.memory_space<vmem>>, vector<8x8xf32>
    %cst_5 = arith.constant dense<0.000000e+00> : vector<8x128xf32>
    %8 = tpu.matmul %7, %6, %cst_5 {dimension_numbers = #tpu.dot_dimension_numbers<[1], [0], [0], [1], [0, 0, 1, 1], [], []>} : vector<8x8xf32>, vector<8x128xf32>, vector<8x128xf32> -> vector<8x128xf32>
    %c0_6 = arith.constant 0 : index
    %c0_7 = arith.constant 0 : index
    %c0_8 = arith.constant 0 : index
    %c0_9 = arith.constant 0 : index
    %9 = vector.load %arg5[%c0_6, %c0_7, %c0_8, %c0_9] : memref<1x1x8x1xf32, #tpu.memory_space<vmem>>, vector<1x1x8x1xf32>
    %10 = vector.shape_cast %9 : vector<1x1x8x1xf32> to vector<8x1xf32>
    %cst_10 = arith.constant dense<0.000000e+00> : vector<8xf32>
    %11 = vector.multi_reduction <add>, %8, %cst_10 [1] : vector<8x128xf32> to vector<8xf32>
    %12 = vector.shape_cast %11 : vector<8xf32> to vector<8x1xf32>
    %13 = arith.addf %10, %12 : vector<8x1xf32>
    %c0_11 = arith.constant 0 : index
    %c0_12 = arith.constant 0 : index
    %c0_13 = arith.constant 0 : index
    %c0_14 = arith.constant 0 : index
    %14 = vector.load %arg5[%c0_11, %c0_12, %c0_13, %c0_14] : memref<1x1x8x1xf32, #tpu.memory_space<vmem>>, vector<1x1x8x1xf32>
    %15 = vector.shape_cast %14 : vector<1x1x8x1xf32> to vector<8x1xf32>
    %16 = vector.shape_cast %13 : vector<8x1xf32> to vector<1x1x8x1xf32>
    tpu.vector_store %arg5[%c0_11, %c0_12, %c0_13, %c0_14], %16 {strides = array<i32>} : memref<1x1x8x1xf32, #tpu.memory_space<vmem>>, vector<1x1x8x1xf32>,
    %c0_15 = arith.constant 0 : index
    %c0_16 = arith.constant 0 : index
    %c0_17 = arith.constant 0 : index
    %c0_18 = arith.constant 0 : index
    %17 = vector.load %arg6[%c0_15, %c0_16, %c0_17, %c0_18] : memref<1x1x8x1xf32, #tpu.memory_space<vmem>>, vector<1x1x8x1xf32>
    %18 = vector.shape_cast %17 : vector<1x1x8x1xf32> to vector<8x1xf32>
    %19 = arith.mulf %8, %8 : vector<8x128xf32>
    %cst_19 = arith.constant dense<0.000000e+00> : vector<8xf32>
    %20 = vector.multi_reduction <add>, %19, %cst_19 [1] : vector<8x128xf32> to vector<8xf32>
    %21 = vector.shape_cast %20 : vector<8xf32> to vector<8x1xf32>
    %22 = arith.addf %18, %21 : vector<8x1xf32>
    %c0_20 = arith.constant 0 : index
    %c0_21 = arith.constant 0 : index
    %c0_22 = arith.constant 0 : index
    %c0_23 = arith.constant 0 : index
    %23 = vector.load %arg6[%c0_20, %c0_21, %c0_22, %c0_23] : memref<1x1x8x1xf32, #tpu.memory_space<vmem>>, vector<1x1x8x1xf32>
    %24 = vector.shape_cast %23 : vector<1x1x8x1xf32> to vector<8x1xf32>
    %25 = vector.shape_cast %22 : vector<8x1xf32> to vector<1x1x8x1xf32>
    tpu.vector_store %arg6[%c0_20, %c0_21, %c0_22, %c0_23], %25 {strides = array<i32>} : memref<1x1x8x1xf32, #tpu.memory_space<vmem>>, vector<1x1x8x1xf32>,
    return
  }
  func.func @transform_0(%arg0: i32, %arg1: i32, %arg2: i32) -> (i32, i32, i32) {
    %c1_i32 = arith.constant 1 : i32
    %0 = arith.muli %arg1, %c1_i32 : i32
    %1 = arith.addi %0, %arg2 : i32
    %c0_i32 = arith.constant 0 : i32
    %c0_i32_0 = arith.constant 0 : i32
    return %arg0, %c0_i32, %1 : i32, i32, i32
  }
  func.func @transform_1(%arg0: i32, %arg1: i32, %arg2: i32) -> (i32, i32) {
    %c0_i32 = arith.constant 0 : i32
    %c0_i32_0 = arith.constant 0 : i32
    %c0_i32_1 = arith.constant 0 : i32
    return %c0_i32, %c0_i32_0 : i32, i32
  }
  func.func @transform_2(%arg0: i32, %arg1: i32, %arg2: i32) -> (i32, i32, i32, i32) {
    %c0_i32 = arith.constant 0 : i32
    %c0_i32_0 = arith.constant 0 : i32
    %c0_i32_1 = arith.constant 0 : i32
    return %arg0, %arg1, %c0_i32, %c0_i32_0 : i32, i32, i32, i32
  }
  func.func @transform_3(%arg0: i32, %arg1: i32, %arg2: i32) -> (i32, i32, i32, i32) {
    %c0_i32 = arith.constant 0 : i32
    %c0_i32_0 = arith.constant 0 : i32
    %c0_i32_1 = arith.constant 0 : i32
    return %arg0, %arg1, %c0_i32, %c0_i32_0 : i32, i32, i32, i32
  }
}

module attributes {stable_mosaic.version = 11 : i64} {
  func.func @_norm_kernel(%arg0: i32, %arg1: i32, %arg2: memref<1x8x128xf32, #tpu.memory_space<vmem>>, %arg3: memref<8x8xf32, #tpu.memory_space<vmem>>, %arg4: memref<8x1xf32, #tpu.memory_space<vmem>>, %arg5: memref<1x8x128xf32, #tpu.memory_space<vmem>>) attributes {dimension_semantics = [#tpu.dimension_semantics<parallel>, #tpu.dimension_semantics<parallel>], iteration_bounds = array<i64: 2, 1>, scalar_prefetch = 0 : i64, scratch_operands = 0 : i64, tpu.core_type = #tpu.core_type<tc>, window_params = [{transform_indices = @transform_0, window_bounds = array<i64: 1, 8, 128>}, {pipeline_mode = #tpu.pipeline_mode<synchronous>, transform_indices = @transform_1, window_bounds = array<i64: 8, 8>}, {pipeline_mode = #tpu.pipeline_mode<synchronous>, transform_indices = @transform_2, window_bounds = array<i64: 8, 1>}, {transform_indices = @transform_3, window_bounds = array<i64: 1, 8, 128>}]} {
    %c0 = arith.constant 0 : index
    %c0_0 = arith.constant 0 : index
    %c0_1 = arith.constant 0 : index
    %0 = vector.load %arg2[%c0, %c0_0, %c0_1] : memref<1x8x128xf32, #tpu.memory_space<vmem>>, vector<1x8x128xf32>
    %1 = vector.shape_cast %0 : vector<1x8x128xf32> to vector<8x128xf32>
    %cst = arith.constant 0.000000e+00 : f32
    %2 = vector.broadcast %cst : f32 to vector<8x128xf32>
    %3 = arith.maximumf %1, %2 : vector<8x128xf32>
    %c0_2 = arith.constant 0 : index
    %c0_3 = arith.constant 0 : index
    %4 = vector.load %arg3[%c0_2, %c0_3] : memref<8x8xf32, #tpu.memory_space<vmem>>, vector<8x8xf32>
    %cst_4 = arith.constant dense<0.000000e+00> : vector<8x128xf32>
    %5 = tpu.matmul %4, %3, %cst_4 {dimension_numbers = #tpu.dot_dimension_numbers<[1], [0], [0], [1], [0, 0, 1, 1], [], []>} : vector<8x8xf32>, vector<8x128xf32>, vector<8x128xf32> -> vector<8x128xf32>
    %c0_5 = arith.constant 0 : index
    %c0_6 = arith.constant 0 : index
    %6 = vector.load %arg4[%c0_5, %c0_6] : memref<8x1xf32, #tpu.memory_space<vmem>>, vector<8x1xf32>
    %7 = vector.broadcast %6 : vector<8x1xf32> to vector<8x128xf32>
    %8 = arith.addf %5, %7 : vector<8x128xf32>
    %c0_7 = arith.constant 0 : index
    %c0_8 = arith.constant 0 : index
    %c0_9 = arith.constant 0 : index
    %9 = vector.load %arg5[%c0_7, %c0_8, %c0_9] : memref<1x8x128xf32, #tpu.memory_space<vmem>>, vector<1x8x128xf32>
    %10 = vector.shape_cast %9 : vector<1x8x128xf32> to vector<8x128xf32>
    %11 = vector.shape_cast %8 : vector<8x128xf32> to vector<1x8x128xf32>
    tpu.vector_store %arg5[%c0_7, %c0_8, %c0_9], %11 {strides = array<i32>} : memref<1x8x128xf32, #tpu.memory_space<vmem>>, vector<1x8x128xf32>,
    return
  }
  func.func @transform_0(%arg0: i32, %arg1: i32) -> (i32, i32, i32) {
    %c0_i32 = arith.constant 0 : i32
    %c0_i32_0 = arith.constant 0 : i32
    return %arg0, %c0_i32, %arg1 : i32, i32, i32
  }
  func.func @transform_1(%arg0: i32, %arg1: i32) -> (i32, i32) {
    %c0_i32 = arith.constant 0 : i32
    %c0_i32_0 = arith.constant 0 : i32
    %c0_i32_1 = arith.constant 0 : i32
    return %c0_i32, %c0_i32_0 : i32, i32
  }
  func.func @transform_2(%arg0: i32, %arg1: i32) -> (i32, i32) {
    %c0_i32 = arith.constant 0 : i32
    %c0_i32_0 = arith.constant 0 : i32
    %c0_i32_1 = arith.constant 0 : i32
    return %c0_i32, %c0_i32_0 : i32, i32
  }
  func.func @transform_3(%arg0: i32, %arg1: i32) -> (i32, i32, i32) {
    %c0_i32 = arith.constant 0 : i32
    %c0_i32_0 = arith.constant 0 : i32
    return %arg0, %c0_i32, %arg1 : i32, i32, i32
  }
}

</mosaic_0001>

<bundles_post_ra>
// kernel: factorized_reduce.2
= control target key start
LH: loop header
LB: loop body
LE: loop exit
PB: predicated region body
PF: predicated region fallthrough
CT: control target
= control target key end

     0   :  { %s475_s12 = smov 0   ;;  %s477_s13 = smov 0   ;;  %s518_s0 = inlined_call_operand.vmem [shape: f32[2,8,128], index: 0, kind: input, shape index: {}]   ;;  %s519_s1 = inlined_call_operand.vmem [shape: f32[8,8], index: 1, kind: input, shape index: {}]   ;;  %s520_s2 = inlined_call_operand.vmem [shape: f32[2,1,8,1], index: 2, kind: output, shape index: {0}]   ;;  %s521_s3 = inlined_call_operand.vmem [shape: f32[2,1,8,1], index: 3, kind: output, shape index: {1}]  }
   0x1   :  { %s479_s14 = smov 0  }
   0x2 LB: > { %s33_s15 = sadd.s32 1, %s448_s13  ;;  %p398_p0 = scmp.ge.s32.totalorder %s452_s14, 1  ;;  %s452_s14 = sphi %s479_s14, %s14_s14   ;;  %s448_s13 = sphi %s477_s13, %s523_s13   ;;  %s444_s12 = sphi %s475_s12, %s522_s12  }
   0x3   : > { %p35_p1 = scmp.ge.s32.totalorder %s33_s15, 2  ;;  %p171_p2 = scmp.lt.s32.totalorder %s452_s14, 3 }
   0x5   : > { %s525_s15 = smov (%p35_p1, %s33_s15), 0  ;;  %p172_p3 = pnand %p398_p0, %p171_p2 }
   0x6   : > { %p208_p4 = scmp.lt.s32.totalorder (!%p172_p3), %s444_s12, 1 }
   0x7   : > { %175 = sbr.rel (%p172_p3) target bundleno = 272 (0x110), region = 28 }
   0xc   : > { %s527_s12 = smov (!%p208_p4, %s444_s12), 1  ;;  %v239_v2 = vld [vmem:[%s519_s1] sm:$0xff]  ;;  %vm240_vm0 = vcmask 64512   ;;  %vm234_vm1 = vcmask 7168   ;;  %v454_v3 = vmov 0.0  }
   0xd   : > { %s399_s16 = sshll.u32 %s527_s12, 3 }
   0xe   : > { %s214_s19 = scalar_lea.vmem %s518_s0, %s399_s16  ;;  %s222_s24 = scalar_lea.vmem %s520_s2, %s399_s16 }
   0xf   : > { %v237_v0 = vld [vmem:[%s214_s19] sm:$0xff]  ;;  %235 = vst.msk [vmem:[%s222_s24] sm:$0xff] %vm234_vm1, %v454_v3  ;;  %s229_s27 = scalar_lea.vmem %s521_s3, %s399_s16 }
  0x10   : > { %v238_v1 = vmax.f32 %v237_v0, 0.0  ;;  %236 = vst.msk [vmem:[%s229_s27] sm:$0xff] %vm234_vm1, %v454_v3 }
  0x12   : > { %259 = vmatpush.msra.mxu0 %v238_v1 }
  0x13   : > { %402 = vmatmul.msk.f32.vlgmr.msra.gmra.mxu0 %vm240_vm0, %v239_v2 }
  0x16   : > { %v264_v6 = vld [vmem:[%s222_s24] sm:$0xff] }
  0x17   : > { %v270_v9 = vld [vmem:[%s229_s27] sm:$0xff] }
  0x90   : > { %v261_v4 = vpop.f32.mrf.mxu0 }
  0x91   : > { %265 = vadd.xlane.f32.xlu0 %v261_v4  ;;  %v271_v5 = vmul.f32 %v261_v4, %v261_v4 }
  0x99   : > { %272 = vadd.xlane.f32.xlu0 %v271_v5 }
 0x104   : > { %v266_v7 = vpop.xlane.xlu0 %265 }
 0x105   : > { %v267_v8 = vadd.f32 %v266_v7, %v264_v6 }
 0x107   : > { %269 = vst.msk [vmem:[%s222_s24] sm:$0xff] %vm234_vm1, %v267_v8 }
 0x10c   : > { %v273_v10 = vpop.xlane.xlu0 %272 }
 0x10d   : > { %v274_v11 = vadd.f32 %v273_v10, %v270_v9 }
 0x10f   : > { %275 = vst.msk [vmem:[%s229_s27] sm:$0xff] %vm234_vm1, %v274_v11 }
 0x110 PF: > { %s14_s14 = sadd.s32 1, %s452_s14   ;;  %s522_s12 = smov %s448_s13 }
 0x111   : > { %p11_p5 = scmp.ge.s32.totalorder %s14_s14, 4   ;;  %s523_s13 = smov %s525_s15 }
 0x113   :  { %13 = sbr.rel (!%p11_p5) target bundleno = 2 (0x2), region = 74 }

// kernel: factorized_reduce.3
= control target key start
LH: loop header
LB: loop body
LE: loop exit
PB: predicated region body
PF: predicated region fallthrough
CT: control target
= control target key end

     0   :  { %s386_s12 = smov 0   ;;  %s388_s13 = smov 0   ;;  %s422_s0 = inlined_call_operand.vmem [shape: f32[2,8,128], index: 0, kind: input, shape index: {}]   ;;  %s423_s1 = inlined_call_operand.vmem [shape: f32[8,8], index: 1, kind: input, shape index: {}]   ;;  %s424_s2 = inlined_call_operand.vmem [shape: f32[8,1], index: 2, kind: input, shape index: {}]   ;;  %s425_s3 = inlined_call_operand.vmem [shape: f32[2,8,128], index: 3, kind: output, shape index: {}]  }
   0x1   :  { %s390_s14 = smov 0  }
   0x2 LB: > { %s25_s15 = sadd.s32 1, %s359_s13  ;;  %p309_p0 = scmp.ge.s32.totalorder %s363_s14, 1  ;;  %s363_s14 = sphi %s390_s14, %s13_s14   ;;  %s359_s13 = sphi %s388_s13, %s427_s13   ;;  %s355_s12 = sphi %s386_s12, %s426_s12  }
   0x3   : > { %p27_p1 = scmp.ge.s32.totalorder %s25_s15, 2  ;;  %p155_p2 = scmp.lt.s32.totalorder %s363_s14, 3 }
   0x5   : > { %s429_s15 = smov (%p27_p1, %s25_s15), 0  ;;  %p156_p3 = pnand %p309_p0, %p155_p2 }
   0x6   : > { %p183_p4 = scmp.lt.s32.totalorder (!%p156_p3), %s355_s12, 1 }
   0x7   : > { %159 = sbr.rel (%p156_p3) target bundleno = 148 (0x94), region = 32 }
   0xc   : > { %v200_v0 = vld [vmem:[%s424_s2] sm:$0xff]  ;;  %v365_v1 = vmov 0   ;;  %s431_s12 = smov (!%p183_p4, %s355_s12), 1  ;;  %vm206_vm0 = vcmask 64512  }
   0xd   : > { %340 = vset.pattern.permute.xlu0 %v365_v1  ;;  %s310_s18 = sshll.u32 %s431_s12, 3  ;;  %v199_v4 = vld [vmem:[%s423_s1] sm:$0xff] }
   0xe   : > { %203 = vperm.xlu0 %340, %v200_v0   ;;  %s189_s21 = scalar_lea.vmem %s422_s0, %s310_s18  ;;  %s196_s26 = scalar_lea.vmem %s425_s3, %s310_s18 }
   0xf   : > { %v197_v2 = vld [vmem:[%s189_s21] sm:$0xff] }
  0x10   : > { %v198_v3 = vmax.f32 %v197_v2, 0.0 }
  0x12   : > { %225 = vmatpush.msra.mxu0 %v198_v3 }
  0x13   : > { %312 = vmatmul.msk.f32.vlgmr.msra.gmra.mxu0 %vm206_vm0, %v199_v4 }
  0x80   : > { %v204_v5 = vpop.permute.xlu0 %203 }
  0x90   : > { %v227_v6 = vpop.f32.mrf.mxu0 }
  0x91   : > { %v228_v7 = vadd.f32 %v227_v6, %v204_v5 }
  0x93   : > { %230 = vst [vmem:[%s196_s26] sm:$0xff] %v228_v7 }
  0x94 PF: > { %s13_s14 = sadd.s32 1, %s363_s14   ;;  %s426_s12 = smov %s359_s13 }
  0x95   : > { %p10_p5 = scmp.ge.s32.totalorder %s13_s14, 4   ;;  %s427_s13 = smov %s429_s15 }
  0x97   :  { %12 = sbr.rel (!%p10_p5) target bundleno = 2 (0x2), region = 62 }

</bundles_post_ra>
